<compile_context>
chip_gen: v6e
topology: v6e:2x2x1
jax: 0.10.0
libtpu: 0.0.40
codegen_flags: <defaults>
</compile_context>

<pallas_src>
import functools

import jax
import jax.numpy as jnp
from jax import lax
from jax.experimental import pallas as pl
from jax.experimental.pallas import tpu as pltpu


def _cdiv(a, b):
    return -(-a // b)


def class_block_kernel(x_ref, w_ref, b_ref, o_ref, acc_ref, *, hw, thw, needs_mask):
    # x_ref:   (Bt, C, thw)  one batch chunk x one HW chunk, HW on the lane axis
    # w_ref:   (C, 2)        fully folded weight chain (includes the 1/HW GAP factor)
    # b_ref:   (1, 2)        fully folded bias
    # o_ref:   (1, Bt, 2)    per-batch-chunk output block (resident across the HW axis)
    # acc_ref: (Bt, C) f32   running GAP (sum) accumulator
    k = pl.program_id(1)

    @pl.when(k == 0)
    def _init():
        acc_ref[...] = jnp.zeros_like(acc_ref)

    x = x_ref[...]
    if needs_mask:
        # Last HW chunk overhangs H*W: zero the out-of-range lanes before reducing.
        lane = lax.broadcasted_iota(jnp.int32, x.shape, 2)
        valid = hw - k * thw
        x = jnp.where(lane < valid, x, 0.0)

    acc_ref[...] += jnp.sum(x, axis=-1)                       # (Bt, C), XLU lane reduce

    @pl.when(k == pl.num_programs(1) - 1)
    def _finalize():
        res = jnp.dot(acc_ref[...], w_ref[...],
                      preferred_element_type=jnp.float32) + b_ref[...]
        o_ref[0] = res.astype(o_ref.dtype)


def fold_params(params, eps=1e-5):
    """Fold conv biases + BN (inference form) + classifier into one (C,2) matrix and (1,2) bias."""
    (w1, b1, g1, be1, m1, v1,
     w2, b2, g2, be2, m2, v2,
     wc, bc) = params
    s1 = g1 / jnp.sqrt(v1 + eps)            # (C1,)
    t1 = be1 - m1 * s1
    s2 = g2 / jnp.sqrt(v2 + eps)            # (C2,)
    t2 = be2 - m2 * s2

    w1f = w1.T * s1[None, :]                # (C,  C1)   conv1 weight with BN1 folded in
    b1f = b1 * s1 + t1                      # (C1,)
    w2f = w2.T * s2[None, :]                # (C1, C2)
    b2f = b2 * s2 + t2                      # (C2,)

    w_tot = w1f @ w2f @ wc.T                # (C, 2)
    b_tot = (b1f @ w2f + b2f) @ wc.T + bc   # (2,)
    return w_tot.astype(jnp.float32), b_tot.reshape(1, 2).astype(jnp.float32)


def class_block_forward(x_nchw, params, vmem_block_budget=2 * 1024 * 1024):
    """x_nchw: (N, C, H, W) float32. Returns (N, 2) logits, or (2,) when N == 1 (PyTorch .squeeze())."""
    w_tot, b_tot = fold_params(params)
    N, C, H, W = x_nchw.shape
    HW = H * W

    # Fold GAP's 1/HW into the weight so the kernel does a pure sum (saves a per-element mul).
    w_tot = (w_tot * (1.0 / float(HW))).astype(jnp.float32)

    # Free reshape (NCHW is contiguous as (N, C, HW)); no transpose / pad pass through HBM.
    x = x_nchw.reshape(N, C, HW)

    # Per-block budget. Double-buffering means ~2x this lands in VMEM; 2 MiB blocks already sit
    # at ~85% of the HBM roofline and fit every generation's default scoped VMEM.
    budget = int(vmem_block_budget)
    try:
        budget = min(budget, pltpu.get_tpu_info().vmem_capacity_bytes // 8)
    except Exception:
        pass

    # HW (lane) tiling: only split when a single sample exceeds the budget and a 128-multiple
    # chunk exists; otherwise take all of HW in one lane-dense block.
    thw = HW
    if C * HW * 4 > budget and HW >= 256:
        thw = (budget // (C * 4)) // 128 * 128
        thw = max(128, min(thw, HW))
    # TODO(synk): if a single sample still exceeds the budget with HW < 256, a C-split reduction
    # axis would be needed; not implemented (vmem_limit_bytes below is raised to cover the block).
    g_hw = _cdiv(HW, thw)
    needs_mask = (HW % thw) != 0

    # Batch chunking: fat chunks, at least 2 grid steps when N >= 2 (v7x megacore sharding),
    # no host-side padding -- the last block may overhang N and its rows are sliced off.
    row_bytes = C * thw * 4
    max_bt = max(1, budget // row_bytes)
    g_b = min(N, max(2, _cdiv(N, max_bt)))
    bt = min(max(1, _cdiv(N, g_b)), max_bt)
    g_b = _cdiv(N, bt)

    in_block = bt * row_bytes
    vmem_limit = int(2 * (in_block + C * 2 * 4 + 2 * 4 + bt * 2 * 4)
                     + bt * C * 4 + (4 << 20))

    kernel = functools.partial(class_block_kernel, hw=HW, thw=thw, needs_mask=needs_mask)

    out = pl.pallas_call(
        kernel,
        out_shape=jax.ShapeDtypeStruct((g_b, bt, 2), jnp.float32),
        grid_spec=pltpu.PrefetchScalarGridSpec(
            num_scalar_prefetch=0,
            grid=(g_b, g_hw),
            in_specs=[
                pl.BlockSpec((bt, C, thw), lambda i, k: (i, 0, k)),   # x chunk (lane-dense HW)
                pl.BlockSpec((C, 2), lambda i, k: (0, 0)),            # folded weight (resident)
                pl.BlockSpec((1, 2), lambda i, k: (0, 0)),            # folded bias (resident)
            ],
            out_specs=pl.BlockSpec((1, bt, 2), lambda i, k: (i, 0, 0)),
            scratch_shapes=[pltpu.VMEM((bt, C), jnp.float32)],
        ),
        compiler_params=pltpu.CompilerParams(
            dimension_semantics=("parallel", "arbitrary"),
            vmem_limit_bytes=vmem_limit),
        cost_estimate=pl.CostEstimate(
            flops=int(N * C * HW + 4 * N * C),
            transcendentals=0,
            bytes_accessed=int(N * C * HW * 4 + C * 8 + 8 + N * 8)),
    )(x, w_tot, b_tot)

    out = out.reshape(g_b * bt, 2)[:N]
    if N == 1:
        out = out[0]          # match PyTorch .squeeze() for batch size 1
    return out


def make_params(key, input_dim):
    """Deterministic raw parameters matching ClassBlock(input_dim, class_num=2) shapes."""
    C = input_dim
    C1 = C // 4
    C2 = C // 16
    ks = jax.random.split(key, 14)

    # Conv2d(C, C1, 1) weight (C1, C, 1, 1) stored as (C1, C), bias (C1,)
    w1 = jax.random.normal(ks[0], (C1, C), jnp.float32) * 0.05
    b1 = jax.random.normal(ks[1], (C1,), jnp.float32) * 0.05
    # BatchNorm2d(C1): gamma, beta, running_mean, running_var
    g1 = 1.0 + 0.1 * jax.random.normal(ks[2], (C1,), jnp.float32)
    be1 = 0.1 * jax.random.normal(ks[3], (C1,), jnp.float32)
    m1 = 0.1 * jax.random.normal(ks[4], (C1,), jnp.float32)
    v1 = 1.0 + 0.1 * jax.random.uniform(ks[5], (C1,), jnp.float32)

    # Conv2d(C1, C2, 1)
    w2 = jax.random.normal(ks[6], (C2, C1), jnp.float32) * 0.05
    b2 = jax.random.normal(ks[7], (C2,), jnp.float32) * 0.05
    # BatchNorm2d(C2)
    g2 = 1.0 + 0.1 * jax.random.normal(ks[8], (C2,), jnp.float32)
    be2 = 0.1 * jax.random.normal(ks[9], (C2,), jnp.float32)
    m2 = 0.1 * jax.random.normal(ks[10], (C2,), jnp.float32)
    v2 = 1.0 + 0.1 * jax.random.uniform(ks[11], (C2,), jnp.float32)

    # Linear(C2, 2)
    wc = jax.random.normal(ks[12], (2, C2), jnp.float32) * 0.1
    bc = jax.random.normal(ks[13], (2,), jnp.float32) * 0.1

    return (w1, b1, g1, be1, m1, v1, w2, b2, g2, be2, m2, v2, wc, bc)


def reference_forward(x_nchw, params, eps=1e-5):
    """Pure-JAX unfused reference (conv1x1 -> BN -> conv1x1 -> BN -> GAP -> Linear), BN in eval form."""
    (w1, b1, g1, be1, m1, v1, w2, b2, g2, be2, m2, v2, wc, bc) = params
    N, C, H, W = x_nchw.shape
    x = jnp.transpose(x_nchw, (0, 2, 3, 1)).reshape(N, H * W, C)
    h1 = x @ w1.T + b1
    h1 = (h1 - m1) / jnp.sqrt(v1 + eps) * g1 + be1
    h2 = h1 @ w2.T + b2
    h2 = (h2 - m2) / jnp.sqrt(v2 + eps) * g2 + be2
    gap = jnp.mean(h2, axis=1)               # (N, C2)
    return gap @ wc.T + bc                   # (N, 2)


if __name__ == "__main__":
    key = jax.random.PRNGKey(0)
    kx, kp = jax.random.split(key)

    # Main config: input_dim = 64 -> C1 = 16, C2 = 4.
    N, C, H, W = 2, 64, 16, 16
    x = jax.random.normal(kx, (N, C, H, W), jnp.float32)
    params = make_params(kp, C)
    out = jax.block_until_ready(class_block_forward(x, params))
    ref = reference_forward(x, params)
    assert out.shape == (N, 2)
    assert jnp.allclose(out, ref, atol=1e-4, rtol=1e-3), (out, ref)

    # Batch-overhang path: bt does not divide N; no host-side pad, garbage rows sliced off.
    xb = jax.random.normal(jax.random.PRNGKey(1), (3, 64, 8, 8), jnp.float32)
    pb = make_params(jax.random.PRNGKey(2), 64)
    outb = jax.block_until_ready(class_block_forward(xb, pb))
    refb = reference_forward(xb, pb)
    assert jnp.allclose(outb, refb, atol=1e-4, rtol=1e-3), (outb, refb)

    # Large-per-sample path: HW split into 128-lane chunks, edge masking, accumulator reduction.
    xc = jax.random.normal(jax.random.PRNGKey(3), (3, 32, 20, 20), jnp.float32)
    pc = make_params(jax.random.PRNGKey(4), 32)
    outc = jax.block_until_ready(class_block_forward(xc, pc, vmem_block_budget=16 * 1024))
    refc = reference_forward(xc, pc)
    assert jnp.allclose(outc, refc, atol=1e-4, rtol=1e-3), (outc, refc)

    # TODO(synk): BatchNorm is implemented in inference (running-stats) form; PyTorch
    # training-mode batch statistics are not modeled (they would break the exact affine fold).
    print("KERNEL_OK")
</pallas_src>

<mosaic_0001>
module attributes {stable_mosaic.version = 11 : i64} {
  func.func @class_block_kernel(%arg0: i32, %arg1: i32, %arg2: memref<1x64x256xf32, #tpu.memory_space<vmem>>, %arg3: memref<64x2xf32, #tpu.memory_space<vmem>>, %arg4: memref<1x2xf32, #tpu.memory_space<vmem>>, %arg5: memref<1x1x2xf32, #tpu.memory_space<vmem>>, %arg6: memref<1x64xf32, #tpu.memory_space<vmem>>) attributes {dimension_semantics = [#tpu.dimension_semantics<parallel>, #tpu.dimension_semantics<arbitrary>], iteration_bounds = array<i64: 2, 1>, scalar_prefetch = 0 : i64, scratch_operands = 1 : i64, tpu.core_type = #tpu.core_type<tc>, window_params = [{transform_indices = @transform_0, window_bounds = array<i64: 1, 64, 256>}, {pipeline_mode = #tpu.pipeline_mode<synchronous>, transform_indices = @transform_1, window_bounds = array<i64: 64, 2>}, {pipeline_mode = #tpu.pipeline_mode<synchronous>, transform_indices = @transform_2, window_bounds = array<i64: 1, 2>}, {transform_indices = @transform_3, window_bounds = array<i64: 1, 1, 2>}]} {
    %c0_i32 = arith.constant 0 : i32
    %0 = arith.cmpi eq, %arg1, %c0_i32 : i32
    %1 = arith.extui %0 : i1 to i32
    %c0_i32_0 = arith.constant 0 : i32
    %2 = arith.cmpi ne, %1, %c0_i32_0 : i32
    scf.if %2 {
      %cst_9 = arith.constant 0.000000e+00 : f32
      %11 = vector.broadcast %cst_9 : f32 to vector<1x64xf32>
      %c0_10 = arith.constant 0 : index
      %c0_11 = arith.constant 0 : index
      %12 = vector.load %arg6[%c0_10, %c0_11] : memref<1x64xf32, #tpu.memory_space<vmem>>, vector<1x64xf32>
      tpu.vector_store %arg6[%c0_10, %c0_11], %11 {strides = array<i32>} : memref<1x64xf32, #tpu.memory_space<vmem>>, vector<1x64xf32>,
    } else {
    }
    %c0 = arith.constant 0 : index
    %c0_1 = arith.constant 0 : index
    %c0_2 = arith.constant 0 : index
    %3 = vector.load %arg2[%c0, %c0_1, %c0_2] : memref<1x64x256xf32, #tpu.memory_space<vmem>>, vector<1x64x256xf32>
    %c0_3 = arith.constant 0 : index
    %c0_4 = arith.constant 0 : index
    %4 = vector.load %arg6[%c0_3, %c0_4] : memref<1x64xf32, #tpu.memory_space<vmem>>, vector<1x64xf32>
    %cst = arith.constant dense<0.000000e+00> : vector<1x64xf32>
    %5 = vector.multi_reduction <add>, %3, %cst [2] : vector<1x64x256xf32> to vector<1x64xf32>
    %6 = arith.addf %4, %5 : vector<1x64xf32>
    %c0_5 = arith.constant 0 : index
    %c0_6 = arith.constant 0 : index
    %7 = vector.load %arg6[%c0_5, %c0_6] : memref<1x64xf32, #tpu.memory_space<vmem>>, vector<1x64xf32>
    tpu.vector_store %arg6[%c0_5, %c0_6], %6 {strides = array<i32>} : memref<1x64xf32, #tpu.memory_space<vmem>>, vector<1x64xf32>,
    %c0_i32_7 = arith.constant 0 : i32
    %8 = arith.cmpi eq, %arg1, %c0_i32_7 : i32
    %9 = arith.extui %8 : i1 to i32
    %c0_i32_8 = arith.constant 0 : i32
    %10 = arith.cmpi ne, %9, %c0_i32_8 : i32
    scf.if %10 {
      %c0_9 = arith.constant 0 : index
      %c0_10 = arith.constant 0 : index
      %11 = vector.load %arg6[%c0_9, %c0_10] : memref<1x64xf32, #tpu.memory_space<vmem>>, vector<1x64xf32>
      %c0_11 = arith.constant 0 : index
      %c0_12 = arith.constant 0 : index
      %12 = vector.load %arg3[%c0_11, %c0_12] : memref<64x2xf32, #tpu.memory_space<vmem>>, vector<64x2xf32>
      %cst_13 = arith.constant dense<0.000000e+00> : vector<1x2xf32>
      %13 = tpu.matmul %11, %12, %cst_13 {dimension_numbers = #tpu.dot_dimension_numbers<[1], [0], [0], [1], [0, 0, 1, 1], [], []>} : vector<1x64xf32>, vector<64x2xf32>, vector<1x2xf32> -> vector<1x2xf32>
      %c0_14 = arith.constant 0 : index
      %c0_15 = arith.constant 0 : index
      %14 = vector.load %arg4[%c0_14, %c0_15] : memref<1x2xf32, #tpu.memory_space<vmem>>, vector<1x2xf32>
      %15 = arith.addf %13, %14 : vector<1x2xf32>
      %c0_16 = arith.constant 0 : index
      %c0_17 = arith.constant 0 : index
      %c0_18 = arith.constant 0 : index
      %16 = vector.load %arg5[%c0_16, %c0_17, %c0_18] : memref<1x1x2xf32, #tpu.memory_space<vmem>>, vector<1x1x2xf32>
      %17 = vector.shape_cast %16 : vector<1x1x2xf32> to vector<1x2xf32>
      %18 = vector.shape_cast %15 : vector<1x2xf32> to vector<1x1x2xf32>
      tpu.vector_store %arg5[%c0_16, %c0_17, %c0_18], %18 {strides = array<i32>} : memref<1x1x2xf32, #tpu.memory_space<vmem>>, vector<1x1x2xf32>,
    } else {
    }
    return
  }
  func.func @transform_0(%arg0: i32, %arg1: i32) -> (i32, i32, i32) {
    %c0_i32 = arith.constant 0 : i32
    %c0_i32_0 = arith.constant 0 : i32
    return %arg0, %c0_i32, %arg1 : i32, i32, i32
  }
  func.func @transform_1(%arg0: i32, %arg1: i32) -> (i32, i32) {
    %c0_i32 = arith.constant 0 : i32
    %c0_i32_0 = arith.constant 0 : i32
    %c0_i32_1 = arith.constant 0 : i32
    return %c0_i32, %c0_i32_0 : i32, i32
  }
  func.func @transform_2(%arg0: i32, %arg1: i32) -> (i32, i32) {
    %c0_i32 = arith.constant 0 : i32
    %c0_i32_0 = arith.constant 0 : i32
    %c0_i32_1 = arith.constant 0 : i32
    return %c0_i32, %c0_i32_0 : i32, i32
  }
  func.func @transform_3(%arg0: i32, %arg1: i32) -> (i32, i32, i32) {
    %c0_i32 = arith.constant 0 : i32
    %c0_i32_0 = arith.constant 0 : i32
    %c0_i32_1 = arith.constant 0 : i32
    return %arg0, %c0_i32, %c0_i32_0 : i32, i32, i32
  }
}

</mosaic_0001>

<bundles_post_ra>
// kernel: tpu_custom_call.1
= control target key start
LH: loop header
LB: loop body
LE: loop exit
PB: predicated region body
PF: predicated region fallthrough
CT: control target
= control target key end

     0   :  { %8 = vsyncpa [#allocation4], 0  ;;  %s1755_s0 = inlined_call_operand.hbm [shape: f32[2,64,256], index: 0, kind: input, shape index: {}]   ;;  %s1756_s1 = inlined_call_operand.vmem [shape: f32[64,2], index: 1, kind: input, shape index: {}]   ;;  %s1757_s2 = inlined_call_operand.vmem [shape: f32[1,2], index: 2, kind: input, shape index: {}]   ;;  %s1758_s3 = inlined_call_operand.hbm [shape: f32[2,1,2], index: 3, kind: output, shape index: {}]  }
   0x1   :  { %10 = vsyncpa [#allocation4 + $0x1], 0 }
   0x2   :  { %11 = vsyncpa [#allocation5], 0 }
   0x3   :  { %13 = vsyncpa [#allocation5 + $0x1], 0  ;;  %s1434_s12 = smov 0   ;;  %s1436_s13 = smov 0  }
   0x4   :  { %s1438_s14 = smov 0   ;;  %s1440_s15 = smov 0  }
   0x5   :  { %s1442_s16 = smov 0   ;;  %s1444_s17 = smov 0  }
   0x6 LB: > { %s1184_s18 = sadd.s32 4294967295, %s1404_s17   ;;  %s1185_s19 = sadd.s32 4294967294, %s1404_s17   ;;  %s1404_s17 = sphi %s1444_s17, %s19_s17   ;;  %s1400_s16 = sphi %s1442_s16, %s1769_s16   ;;  %s1396_s15 = sphi %s1440_s15, %s1768_s15   ;;  %s1392_s14 = sphi %s1438_s14, %s1767_s14   ;;  %s1388_s13 = sphi %s1436_s13, %s1766_s13   ;;  %s1384_s12 = sphi %s1434_s12, %s1765_s12  }
   0x7   : > { %s31_s20 = sadd.s32 1, %s1400_s16  ;;  %s40_s21 = sadd.s32 1, %s1392_s14 }
   0x8   : > { %p33_p0 = scmp.ge.s32.totalorder %s31_s20, 2  ;;  %p47_p1 = scmp.ne.s32.totalorder %s1392_s14, %s1388_s13 }
   0x9   : > { %p48_p2 = scmp.eq.s32.totalorder %s1404_s17, 0  ;;  %p53_p3 = scmp.ne.s32.totalorder %s1388_s13, %s1384_s12 }
   0xa   : > { %s1771_s20 = smov (%p33_p0, %s31_s20), 0  ;;  %p54_p5 = scmp.eq.s32.totalorder %s1184_s18, 0 }
   0xb   : > { %p1475_p4 = por %p48_p2, %p47_p1  ;;  %s35_s23 = ssub.s32 %s1400_s16, %s1771_s20 }
   0xc   : > { %p119_p6 = scmp.eq.s32.totalorder %s1184_s18, 1  ;;  %p38_p7 = scmp.eq.s32.totalorder %s35_s23, 0 }
   0xd   : > { %p1481_p8 = por %p54_p5, %p53_p3  ;;  %p125_p10 = scmp.eq.s32.totalorder %s1185_s19, 1 }
   0xe   : > { %p1485_p9 = por %p119_p6, %p47_p1  ;;  %p1238_p13 = scmp.lt.s32.totalorder %s1404_s17, 2 }
   0xf   : > { %s1490_s26 = scalar_select %p38_p7, %s1392_s14, %s40_s21  }
  0x10   : > { %p1492_p11 = por %p125_p10, %p53_p3  ;;  %s151_s28 = sand.u32 1, %s1392_s14  }
  0x11   : > { %s1188_s29 = sshll.u32 %s151_s28, 7  ;;  %s1197_s30 = sshll.u32 %s1400_s16, 11 }
  0x12   : > { %s163_s6 = scalar_lea.hbm %s1755_s0, %s1197_s30  ;;  %s155_s7 = scalar_lea.vmem [#allocation3], %s1188_s29 }
  0x13   : > { %s164_s8 = sshll.u32 %s155_s7, 4  ;;  %p1505_p0 = pnand %p1238_p13, %p1475_p4  ;;  %s165_s8 = int_to_ptr.vmem [resolvable:$true] %s164_s8 }
  0x14   : > { %p1191_p1 = scmp.ge.s32.totalorder %s1404_s17, 1  ;;  %s152_s10 = scalar_lea.sflag [#allocation4], %s151_s28 }
  0x15   : > { %p1298_p2 = pneg %p1505_p0  ;;  %s1309_s11 = scalar_lea.vmem %s165_s8, 2048 }
  0x16   : > { %p1310_p3 = scmp.ne.s32.totalorder %s165_s8, %s1309_s11  ;;  %s1406_s18 = smov [#allocation3]  }
  0x17   : > { %s1314_s19 = sshll.u32 %s1406_s18, 4  ;;  %s1315_s19 = int_to_ptr.vmem [resolvable:$false] %s1314_s19 }
  0x18   : > { %p1312_p5 = pnand %p1310_p3, %p1298_p2  ;;  %s1316_s21 = scalar_lea.vmem %s1315_s19, 4096 }
  0x19   : > { %p1317_p7 = scmp.lt.s32.totalorder %s165_s8, %s1315_s19  ;;  %p1318_p10 = scmp.lt.s32.totalorder %s1316_s21, %s1309_s11 }
  0x1a   : > { %p1313_p6 = pneg %p1312_p5 }
  0x1b   : > { %p1319_p12 = por %p1318_p10, %p1317_p7 }
  0x1d   : > { %p1320_p4 = pnand %p1319_p12, %p1313_p6 }
  0x1f   : > { %1323 = shalt.err (!%p1320_p4)
}
  0x20   : > { %s1407_s22 = smov 256   ;;  %s1408_s23 = smov 16  }
  0x21   : > { %1233 = dma.hbm_to_vmem [thread:$0]  (!%p1505_p0), %s163_s6, 2048, %s165_s8, %s152_s10, %s1407_s22, %s1407_s22, %s1408_s23  }
  0x22   : > { %p172_p13 = scmp.lt.s32.totalorder %s1404_s17, 3 }
  0x24   : > { %p173_p2 = pnand %p1191_p1, %p172_p13 }
  0x25   : > { %s1518_s28 = sand.u32 (!%p173_p2), 1, %s1388_s13  }
  0x26   : > { %176 = sbr.rel (%p173_p2) target bundleno = 583 (0x247), region = 32  ;;  %s1192_s29 = sshll.u32 (!%p173_p2), %s1518_s28, 7 }
  0x27   : > { %s179_s30 = scalar_lea.sflag (!%p173_p2), [#allocation4], %s1518_s28  ;;  %s182_s4 = scalar_lea.vmem (!%p173_p2), [#allocation3], %s1192_s29 }
  0x2b   : > { %1375 = dma.done.wait (%p1481_p8), %s179_s30, 2048  }
  0x2c   : > { %1377 = vsyncadd (%p1481_p8), %s179_s30, 4294965248  ;;  %v211_v0 = vld [vmem:[%s182_s4] sm:$0xff]  ;;  %v212_v1 = vld [vmem:[%s182_s4 + $0x8] sm:$0xff]  ;;  %v1409_v24 = vmov 0   ;;  %v260_v25 = vlaneseq  ;;  %v1410_v26 = vmov 1966171168  }
  0x2d   : > { %v213_v2 = vld [vmem:[%s182_s4 + $0x10] sm:$0xff]  ;;  %v228_v3 = vadd.f32 %v212_v1, %v211_v0  ;;  %v214_v4 = vld [vmem:[%s182_s4 + $0x18] sm:$0xff]  ;;  %v215_v5 = vld [vmem:[%s182_s4 + $0x20] sm:$0xff]  ;;  %1294 = vset.pattern.permute.xlu0 %v1409_v24  ;;  %1295 = vset.pattern.permute.xlu1 %v1409_v24  ;;  %v521_v27 = vunpack.c.l.s4 %v1410_v26  ;;  %vm209_vm0 = vcmask 516096   ;;  %vm1412_vm1 = vmmov 0   ;;  %s1194_s6 = sshll.u32 %s1396_s15, 4 }
  0x2e   : > { %v216_v6 = vld [vmem:[%s182_s4 + $0x28] sm:$0xff]  ;;  %v217_v8 = vld [vmem:[%s182_s4 + $0x30] sm:$0xff]  ;;  %v218_v9 = vld [vmem:[%s182_s4 + $0x38] sm:$0xff]  ;;  %v231_v10 = vadd.f32 %v214_v4, %v213_v2  ;;  %v1527_v28 = vshrl.u32 %v260_v25, 7  ;;  %vm943_vm2 = vcmask 130112   ;;  %vm950_vm3 = vcmask 195712   ;;  %s1713_s11 = scalar_lea.hbm %s1758_s3, %s1194_s6 }
  0x2f   : > { %v234_v7 = vadd.f32 %v216_v6, %v215_v5  ;;  %229 = vadd.xlane.f32.xlu0 %v228_v3  ;;  %v237_v11 = vadd.f32 %v218_v9, %v217_v8  ;;  %v219_v12 = vld [vmem:[%s182_s4 + $0x40] sm:$0xff]  ;;  %v220_v13 = vld [vmem:[%s182_s4 + $0x48] sm:$0xff]  ;;  %v221_v14 = vld [vmem:[%s182_s4 + $0x50] sm:$0xff]  ;;  %v522_v29 = vunpack.c.0.s8 %v521_v27  ;;  %vm957_vm4 = vcmask 261312   ;;  %s203_s7 = scalar_lea.vmem [#allocation6], %s1518_s28  ;;  %s1095_s18 = scalar_lea.sflag [#allocation5], %s1518_s28 }
  0x30   : > { %v222_v15 = vld [vmem:[%s182_s4 + $0x58] sm:$0xff]  ;;  %v240_v16 = vadd.f32 %v220_v13, %v219_v12  ;;  %v223_v18 = vld [vmem:[%s182_s4 + $0x60] sm:$0xff]  ;;  %v224_v19 = vld [vmem:[%s182_s4 + $0x68] sm:$0xff]  ;;  %v1530_v30 = vsub.s32 0, %v1527_v28  ;;  %v1533_v31 = vsub.s32 1, %v1527_v28  ;;  %v1536_v32 = vsub.s32 2, %v1527_v28 }
  0x31   : > { %235 = vadd.xlane.f32.xlu1 %v234_v7  ;;  %v243_v17 = vadd.f32 %v222_v15, %v221_v14  ;;  %v225_v20 = vld [vmem:[%s182_s4 + $0x70] sm:$0xff]  ;;  %v226_v21 = vld [vmem:[%s182_s4 + $0x78] sm:$0xff]  ;;  %v246_v22 = vadd.f32 %v224_v19, %v223_v18  ;;  %v1539_v33 = vsub.s32 3, %v1527_v28  ;;  %v1542_v34 = vsub.s32 4, %v1527_v28  ;;  %s1107_s8 = sshll.u32 %s203_s7, 4  ;;  %s1413_s15 = smov [#allocation6]   ;;  %s1108_s8 = int_to_ptr.vmem [resolvable:$true] %s1107_s8 }
  0x32   : > { %v249_v23 = vadd.f32 %v226_v21, %v225_v20  ;;  %v1545_v35 = vsub.s32 5, %v1527_v28  ;;  %v1548_v36 = vsub.s32 6, %v1527_v28  ;;  %v1551_v37 = vsub.s32 7, %v1527_v28  ;;  %s1324_s19 = scalar_lea.vmem %s1108_s8, 16  ;;  %s1328_s21 = sshll.u32 %s1413_s15, 4  ;;  %s1329_s21 = int_to_ptr.vmem [resolvable:$false] %s1328_s21 }
  0x33   : > { %232 = vadd.xlane.f32.xlu0 %v231_v10  ;;  %v1554_v39 = vsub.s32 %v522_v29, %v1527_v28  ;;  %vm964_vm5 = vcmask 326912   ;;  %vm971_vm6 = vcmask 392512   ;;  %vm978_vm7 = vcmask 458112   ;;  %p1325_p8 = scmp.ne.s32.totalorder %s1108_s8, %s1324_s19  ;;  %s1330_s22 = scalar_lea.vmem %s1329_s21, 32 }
  0x34   : > { %vm985_vm8 = vcmask 523712   ;;  %vm1018_vm9 = vcmask 523264   ;;  %vm1092_vm10 = vcmask 8192   ;;  %p1331_p1 = scmp.lt.s32.totalorder %s1108_s8, %s1329_s21  ;;  %p1332_p3 = scmp.lt.s32.totalorder %s1330_s22, %s1324_s19 }
  0x35   : > { %238 = vadd.xlane.f32.xlu1 %v237_v11  ;;  %p1326_p12 = pnand %p1325_p8, %p1485_p9 }
  0x36   : > { %p1333_p5 = por %p1332_p3, %p1331_p1 }
  0x37   : > { %241 = vadd.xlane.f32.xlu0 %v240_v16  ;;  %p1327_p0 = pneg %p1326_p12 }
  0x39   : > { %244 = vadd.xlane.f32.xlu1 %v243_v17  ;;  %p1334_p6 = pnand %p1333_p5, %p1327_p0 }
  0x3b   : > { %247 = vadd.xlane.f32.xlu0 %v246_v22 }
  0x3d   : > { %250 = vadd.xlane.f32.xlu1 %v249_v23 }
  0xb8   : > { %v230_v38 = vpop.xlane.xlu0 %229 }
  0xb9   : > { %v263_v41 = vrot.slane %v230_v38, %v1530_v30  ;;  %v267_v42 = vrot.slane %v230_v38, %v1533_v31  ;;  %v271_v43 = vrot.slane %v230_v38, %v1536_v32  ;;  %v275_v44 = vrot.slane %v230_v38, %v1539_v33 }
  0xba   : > { %v236_v40 = vpop.xlane.xlu1 %235  ;;  %v279_v45 = vrot.slane %v230_v38, %v1542_v34  ;;  %v283_v46 = vrot.slane %v230_v38, %v1545_v35  ;;  %v287_v47 = vrot.slane %v230_v38, %v1548_v36  ;;  %v291_v48 = vrot.slane %v230_v38, %v1551_v37 }
  0xbb   : > { %v516_v49 = vcombine.low %v263_v41, %v267_v42  ;;  %v517_v50 = vcombine.low %v271_v43, %v275_v44  ;;  %v327_v51 = vrot.slane %v236_v40, %v1530_v30  ;;  %v331_v52 = vrot.slane %v236_v40, %v1533_v31 }
  0xbc   : > { %v233_v53 = vpop.xlane.xlu0 %232  ;;  %v518_v54 = vcombine.low %v279_v45, %v283_v46  ;;  %v519_v55 = vcombine.low %v287_v47, %v291_v48  ;;  %v335_v56 = vrot.slane %v236_v40, %v1536_v32  ;;  %v339_v57 = vrot.slane %v236_v40, %v1539_v33 }
  0xbd   : > { %v526_v58 = vrot.slane %v516_v49, %v1554_v39  ;;  %v533_v59 = vrot.slane %v517_v50, %v1554_v39  ;;  %v295_v60 = vrot.slane %v233_v53, %v1530_v30  ;;  %v299_v61 = vrot.slane %v233_v53, %v1533_v31 }
  0xbe   : > { %v540_v62 = vrot.slane %v518_v54, %v1554_v39  ;;  %v547_v63 = vrot.slane %v519_v55, %v1554_v39  ;;  %v303_v0 = vrot.slane %v233_v53, %v1536_v32  ;;  %v307_v1 = vrot.slane %v233_v53, %v1539_v33  ;;  %v239_v14 = vpop.xlane.xlu1 %238 }
  0xbf   : > { %v548_v2 = vcombine.low %v526_v58, %v533_v59  ;;  %v311_v3 = vrot.slane %v233_v53, %v1542_v34  ;;  %v315_v4 = vrot.slane %v233_v53, %v1545_v35  ;;  %v319_v5 = vrot.slane %v233_v53, %v1548_v36 }
  0xc0   : > { %v549_v6 = vcombine.low %v540_v62, %v547_v63  ;;  %v323_v7 = vrot.slane %v233_v53, %v1551_v37  ;;  %v565_v8 = vcombine.low %v295_v60, %v299_v61  ;;  %v566_v9 = vcombine.low %v303_v0, %v307_v1  ;;  %v242_v50 = vpop.xlane.xlu0 %241 }
  0xc1   : > { %v556_v10 = vrot.slane %v548_v2, %v1554_v39  ;;  %v567_v11 = vcombine.low %v311_v3, %v315_v4  ;;  %v343_v12 = vrot.slane %v236_v40, %v1542_v34  ;;  %v347_v13 = vrot.slane %v236_v40, %v1545_v35 }
  0xc2   : > { %v563_v15 = vrot.slane %v549_v6, %v1554_v39  ;;  %v568_v16 = vcombine.low %v319_v5, %v323_v7  ;;  %v575_v17 = vrot.slane %v565_v8, %v1554_v39  ;;  %v582_v18 = vrot.slane %v566_v9, %v1554_v39  ;;  %v245_v3 = vpop.xlane.xlu1 %244 }
  0xc3   : > { %v589_v19 = vrot.slane %v567_v11, %v1554_v39  ;;  %v351_v20 = vrot.slane %v236_v40, %v1548_v36  ;;  %v355_v21 = vrot.slane %v236_v40, %v1551_v37  ;;  %v614_v22 = vcombine.low %v327_v51, %v331_v52 }
  0xc4   : > { %v564_v23 = vcombine.low %v556_v10, %v563_v15  ;;  %v596_v24 = vrot.slane %v568_v16, %v1554_v39  ;;  %v597_v26 = vcombine.low %v575_v17, %v582_v18  ;;  %v615_v27 = vcombine.low %v335_v56, %v339_v57 }
  0xc5   : > { %v616_v29 = vcombine.low %v343_v12, %v347_v13  ;;  %v617_v38 = vcombine.low %v351_v20, %v355_v21  ;;  %v624_v41 = vrot.slane %v614_v22, %v1554_v39  ;;  %v359_v42 = vrot.slane %v239_v14, %v1530_v30 }
  0xc6   : > { %909 = vperm.xlu0 %1294, %v564_v23   ;;  %v598_v43 = vcombine.low %v589_v19, %v596_v24  ;;  %v605_v44 = vrot.slane %v597_v26, %v1554_v39  ;;  %v631_v45 = vrot.slane %v615_v27, %v1554_v39  ;;  %v363_v40 = vrot.slane %v239_v14, %v1533_v31 }
  0xc7   : > { %v638_v46 = vrot.slane %v616_v29, %v1554_v39  ;;  %v645_v47 = vrot.slane %v617_v38, %v1554_v39  ;;  %v367_v48 = vrot.slane %v239_v14, %v1536_v32  ;;  %v371_v49 = vrot.slane %v239_v14, %v1539_v33  ;;  %v248_v38 = vpop.xlane.xlu0 %247 }
  0xc8   : > { %v612_v51 = vrot.slane %v598_v43, %v1554_v39  ;;  %v646_v52 = vcombine.low %v624_v41, %v631_v45  ;;  %v375_v53 = vrot.slane %v239_v14, %v1542_v34  ;;  %v379_v54 = vrot.slane %v239_v14, %v1545_v35 }
  0xc9   : > { %v647_v55 = vcombine.low %v638_v46, %v645_v47  ;;  %v383_v56 = vrot.slane %v239_v14, %v1548_v36  ;;  %v387_v57 = vrot.slane %v239_v14, %v1551_v37  ;;  %v663_v58 = vcombine.low %v359_v42, %v363_v40 }
  0xca   : > { %v613_v59 = vcombine.low %v605_v44, %v612_v51  ;;  %v654_v60 = vrot.slane %v646_v52, %v1554_v39  ;;  %v664_v61 = vcombine.low %v367_v48, %v371_v49  ;;  %v665_v62 = vcombine.low %v375_v53, %v379_v54 }
  0xcb   : > { %v661_v63 = vrot.slane %v647_v55, %v1554_v39  ;;  %v666_v0 = vcombine.low %v383_v56, %v387_v57  ;;  %v673_v1 = vrot.slane %v663_v58, %v1554_v39  ;;  %v391_v2 = vrot.slane %v242_v50, %v1530_v30 }
  0xcc   : > { %912 = vperm.xlu1 %1295, %v613_v59   ;;  %v680_v4 = vrot.slane %v664_v61, %v1554_v39  ;;  %v687_v5 = vrot.slane %v665_v62, %v1554_v39  ;;  %v395_v6 = vrot.slane %v242_v50, %v1533_v31  ;;  %v399_v7 = vrot.slane %v242_v50, %v1536_v32 }
  0xcd   : > { %v662_v8 = vcombine.low %v654_v60, %v661_v63  ;;  %v694_v9 = vrot.slane %v666_v0, %v1554_v39  ;;  %v403_v10 = vrot.slane %v242_v50, %v1539_v33  ;;  %v407_v11 = vrot.slane %v242_v50, %v1542_v34  ;;  %v251_v60 = vpop.xlane.xlu1 %250 }
  0xce   : > { %v695_v12 = vcombine.low %v673_v1, %v680_v4  ;;  %v411_v13 = vrot.slane %v242_v50, %v1545_v35  ;;  %v415_v14 = vrot.slane %v242_v50, %v1548_v36  ;;  %v419_v15 = vrot.slane %v242_v50, %v1551_v37 }
  0xcf   : > { %v696_v16 = vcombine.low %v687_v5, %v694_v9  ;;  %v712_v17 = vcombine.low %v391_v2, %v395_v6  ;;  %v713_v18 = vcombine.low %v399_v7, %v403_v10  ;;  %v423_v19 = vrot.slane %v245_v3, %v1530_v30 }
  0xd0   : > { %915 = vperm.xlu1 %1295, %v662_v8   ;;  %v703_v20 = vrot.slane %v695_v12, %v1554_v39  ;;  %v714_v21 = vcombine.low %v407_v11, %v411_v13  ;;  %v715_v22 = vcombine.low %v415_v14, %v419_v15  ;;  %v427_v23 = vrot.slane %v245_v3, %v1533_v31 }
  0xd1   : > { %v710_v24 = vrot.slane %v696_v16, %v1554_v39  ;;  %v722_v26 = vrot.slane %v712_v17, %v1554_v39  ;;  %v729_v27 = vrot.slane %v713_v18, %v1554_v39  ;;  %v431_v29 = vrot.slane %v245_v3, %v1536_v32 }
  0xd2   : > { %v736_v41 = vrot.slane %v714_v21, %v1554_v39  ;;  %v743_v42 = vrot.slane %v715_v22, %v1554_v39  ;;  %v435_v43 = vrot.slane %v245_v3, %v1539_v33  ;;  %v439_v44 = vrot.slane %v245_v3, %v1542_v34 }
  0xd3   : > { %v711_v45 = vcombine.low %v703_v20, %v710_v24  ;;  %v744_v40 = vcombine.low %v722_v26, %v729_v27  ;;  %v443_v46 = vrot.slane %v245_v3, %v1545_v35  ;;  %v447_v47 = vrot.slane %v245_v3, %v1548_v36 }
  0xd4   : > { %v745_v48 = vcombine.low %v736_v41, %v743_v42  ;;  %v451_v49 = vrot.slane %v245_v3, %v1551_v37  ;;  %v761_v50 = vcombine.low %v423_v19, %v427_v23  ;;  %v762_v51 = vcombine.low %v431_v29, %v435_v43 }
  0xd5   : > { %918 = vperm.xlu1 %1295, %v711_v45   ;;  %v752_v52 = vrot.slane %v744_v40, %v1554_v39  ;;  %v763_v53 = vcombine.low %v439_v44, %v443_v46  ;;  %v455_v54 = vrot.slane %v248_v38, %v1530_v30  ;;  %v459_v55 = vrot.slane %v248_v38, %v1533_v31 }
  0xd6   : > { %v759_v56 = vrot.slane %v745_v48, %v1554_v39  ;;  %v764_v57 = vcombine.low %v447_v47, %v451_v49  ;;  %v771_v58 = vrot.slane %v761_v50, %v1554_v39  ;;  %v778_v59 = vrot.slane %v762_v51, %v1554_v39  ;;  %v1016_v47 = vld [vmem:[%s1756_s1 + $0x38] sm:$0xff]  ;;  %v1015_v50 = vld [vmem:[%s1756_s1 + $0x30] sm:$0xff]  ;;  %v1014_v51 = vld [vmem:[%s1756_s1 + $0x28] sm:$0xff] }
  0xd7   : > { %v785_v61 = vrot.slane %v763_v53, %v1554_v39  ;;  %v463_v62 = vrot.slane %v248_v38, %v1536_v32  ;;  %v467_v63 = vrot.slane %v248_v38, %v1539_v33  ;;  %v471_v0 = vrot.slane %v248_v38, %v1542_v34  ;;  %v1012_v53 = vld [vmem:[%s1756_s1 + $0x18] sm:$0xff] }
  0xd8   : > { %v760_v1 = vcombine.low %v752_v52, %v759_v56  ;;  %v792_v2 = vrot.slane %v764_v57, %v1554_v39  ;;  %v793_v3 = vcombine.low %v771_v58, %v778_v59  ;;  %v475_v4 = vrot.slane %v248_v38, %v1545_v35  ;;  %v1013_v52 = vld [vmem:[%s1756_s1 + $0x20] sm:$0xff] }
  0xd9   : > { %v479_v5 = vrot.slane %v248_v38, %v1548_v36  ;;  %v483_v6 = vrot.slane %v248_v38, %v1551_v37  ;;  %v810_v7 = vcombine.low %v455_v54, %v459_v55  ;;  %v811_v8 = vcombine.low %v463_v62, %v467_v63  ;;  %v1011_v54 = vld [vmem:[%s1756_s1 + $0x10] sm:$0xff]  ;;  %v1010_v55 = vld [vmem:[%s1756_s1 + $0x8] sm:$0xff]  ;;  %v1009_v56 = vld [vmem:[%s1756_s1] sm:$0xff] }
  0xda   : > { %921 = vperm.xlu1 %1295, %v760_v1   ;;  %v794_v9 = vcombine.low %v785_v61, %v792_v2  ;;  %v801_v10 = vrot.slane %v793_v3, %v1554_v39  ;;  %v812_v11 = vcombine.low %v471_v0, %v475_v4  ;;  %v487_v12 = vrot.slane %v251_v60, %v1530_v30 }
  0xdb   : > { %v813_v13 = vcombine.low %v479_v5, %v483_v6  ;;  %v820_v14 = vrot.slane %v810_v7, %v1554_v39  ;;  %v827_v15 = vrot.slane %v811_v8, %v1554_v39  ;;  %v491_v16 = vrot.slane %v251_v60, %v1533_v31 }
  0xdc   : > { %v808_v17 = vrot.slane %v794_v9, %v1554_v39  ;;  %v834_v18 = vrot.slane %v812_v11, %v1554_v39  ;;  %v495_v19 = vrot.slane %v251_v60, %v1536_v32  ;;  %v499_v20 = vrot.slane %v251_v60, %v1539_v33 }
  0xdd   : > { %v841_v21 = vrot.slane %v813_v13, %v1554_v39  ;;  %v842_v22 = vcombine.low %v820_v14, %v827_v15  ;;  %v503_v30 = vrot.slane %v251_v60, %v1542_v34  ;;  %v507_v23 = vrot.slane %v251_v60, %v1545_v35 }
  0xde   : > { %v809_v24 = vcombine.low %v801_v10, %v808_v17  ;;  %v511_v26 = vrot.slane %v251_v60, %v1548_v36  ;;  %v515_v31 = vrot.slane %v251_v60, %v1551_v37  ;;  %v859_v27 = vcombine.low %v487_v12, %v491_v16 }
  0xdf   : > { %v843_v29 = vcombine.low %v834_v18, %v841_v21  ;;  %v850_v38 = vrot.slane %v842_v22, %v1554_v39  ;;  %v860_v41 = vcombine.low %v495_v19, %v499_v20  ;;  %v861_v32 = vcombine.low %v503_v30, %v507_v23 }
  0xe0   : > { %924 = vperm.xlu1 %1295, %v809_v24   ;;  %v862_v33 = vcombine.low %v511_v26, %v515_v31  ;;  %v869_v42 = vrot.slane %v859_v27, %v1554_v39  ;;  %v1411_v49 = vmov 0.0   ;;  %v933_v60 = vand.u32 127, %v260_v25 }
  0xe1   : > { %v857_v43 = vrot.slane %v843_v29, %v1554_v39  ;;  %v876_v34 = vrot.slane %v860_v41, %v1554_v39  ;;  %v883_v35 = vrot.slane %v861_v32, %v1554_v39  ;;  %210 = vst.msk [vmem:[#allocation2] sm:$0x1] %vm209_vm0, %v1411_v49  ;;  %1207 = vmatprep.subr.mxu0 %v1411_v49 }
  0xe2   : > { %v890_v36 = vrot.slane %v862_v33, %v1554_v39  ;;  %1208 = vmatpush3.msra.mxu0 %v1016_v47  ;;  %1223 = vmatprep.mubr.msk.f32.mxu0 %vm1412_vm1, %v1411_v49  ;;  %v938_v62 = vadd.s32 4294967288, %v933_v60  ;;  %v945_v63 = vadd.s32 4294967280, %v933_v60  ;;  %v952_v0 = vadd.s32 4294967272, %v933_v60 }
  0xe3   : > { %v858_v44 = vcombine.low %v850_v38, %v857_v43  ;;  %v891_v37 = vcombine.low %v869_v42, %v876_v34  ;;  %1209 = vmatprep.subr.mxu0 %v1411_v49  ;;  %v959_v1 = vadd.s32 4294967264, %v933_v60  ;;  %v966_v3 = vadd.s32 4294967256, %v933_v60  ;;  %v1017_v43 = vld [vmem:[%s1757_s2] sm:$0x1] }
  0xe4   : > { %v892_v45 = vcombine.low %v883_v35, %v890_v36  ;;  %1210 = vmatpush3.msra.mxu0 %v1015_v50  ;;  %v941_v2 = vsub.s32 %v938_v62, %v1527_v28  ;;  %v948_v4 = vsub.s32 %v945_v63, %v1527_v28  ;;  %v973_v6 = vadd.s32 4294967248, %v933_v60 }
  0xe5   : > { %927 = vperm.xlu1 %1295, %v858_v44   ;;  %v899_v40 = vrot.slane %v891_v37, %v1554_v39  ;;  %1211 = vmatprep.subr.mxu0 %v1411_v49  ;;  %v936_v7 = vsub.s32 %v933_v60, %v1527_v28  ;;  %v955_v8 = vsub.s32 %v952_v0, %v1527_v28  ;;  %v980_v12 = vadd.s32 4294967240, %v933_v60 }
  0xe6   : > { %v906_v46 = vrot.slane %v892_v45, %v1554_v39  ;;  %1212 = vmatpush3.msra.mxu0 %v1014_v51  ;;  %v962_v10 = vsub.s32 %v959_v1, %v1527_v28  ;;  %v969_v11 = vsub.s32 %v966_v3, %v1527_v28  ;;  %v976_v14 = vsub.s32 %v973_v6, %v1527_v28 }
  0xe7   : > { %1213 = vmatprep.subr.mxu0 %v1411_v49  ;;  %v983_v21 = vsub.s32 %v980_v12, %v1527_v28 }
  0xe8   : > { %v907_v48 = vcombine.low %v899_v40, %v906_v46  ;;  %1214 = vmatpush3.msra.mxu0 %v1013_v52  ;;  %v227_v32 = vld [vmem:[#allocation2] sm:$0x1] }
  0xe9   : > { %1215 = vmatprep.subr.mxu0 %v1411_v49 }
  0xea   : > { %930 = vperm.xlu1 %1295, %v907_v48   ;;  %1216 = vmatpush3.msra.mxu0 %v1012_v53 }
  0xeb   : > { %1217 = vmatprep.subr.mxu0 %v1411_v49 }
  0xec   : > { %1218 = vmatpush3.msra.mxu0 %v1011_v54 }
  0xed   : > { %1219 = vmatprep.subr.mxu0 %v1411_v49 }
  0xee   : > { %1220 = vmatpush3.msra.mxu0 %v1010_v55 }
  0xef   : > { %1221 = vmatprep.subr.mxu0 %v1411_v49 }
  0xf0   : > { %1222 = vmatpush3.msra.mxu0 %v1009_v56 }
 0x141   : > { %v910_v9 = vpop.permute.xlu0 %909 }
 0x142   : > { %v937_v15 = vrot.slane %v910_v9, %v936_v7 }
 0x147   : > { %v913_v57 = vpop.permute.xlu1 %912 }
 0x148   : > { %v942_v25 = vrot.slane %v913_v57, %v941_v2 }
 0x14a   : > { %v944_v19 = vsel %vm943_vm2, %v942_v25, %v937_v15 }
 0x14b   : > { %v916_v58 = vpop.permute.xlu1 %915 }
 0x14c   : > { %v949_v13 = vrot.slane %v916_v58, %v948_v4 }
 0x14e   : > { %v951_v22 = vsel %vm950_vm3, %v949_v13, %v944_v19 }
 0x150   : > { %v919_v59 = vpop.permute.xlu1 %918 }
 0x151   : > { %v956_v16 = vrot.slane %v919_v59, %v955_v8 }
 0x153   : > { %v958_v23 = vsel %vm957_vm4, %v956_v16, %v951_v22 }
 0x155   : > { %v922_v61 = vpop.permute.xlu1 %921 }
 0x156   : > { %v963_v18 = vrot.slane %v922_v61, %v962_v10 }
 0x158   : > { %v965_v24 = vsel %vm964_vm5, %v963_v18, %v958_v23 }
 0x15b   : > { %v925_v5 = vpop.permute.xlu1 %924 }
 0x15c   : > { %v970_v20 = vrot.slane %v925_v5, %v969_v11 }
 0x15e   : > { %v972_v31 = vsel %vm971_vm6, %v970_v20, %v965_v24 }
 0x160   : > { %v928_v17 = vpop.permute.xlu1 %927 }
 0x161   : > { %v977_v30 = vrot.slane %v928_v17, %v976_v14 }
 0x163   : > { %v979_v29 = vsel %vm978_vm7, %v977_v30, %v972_v31 }
 0x165   : > { %v931_v26 = vpop.permute.xlu1 %930 }
 0x166   : > { %v984_v27 = vrot.slane %v931_v26, %v983_v21 }
 0x168   : > { %v986_v38 = vsel %vm985_vm8, %v984_v27, %v979_v29 }
 0x169   : > { %v993_v41 = vrot.slane %v986_v38, %v1554_v39 }
 0x16b   : > { %v1000_v33 = vrot.slane %v993_v41, %v1554_v39 }
 0x16d   : > { %v1002_v28 = vadd.f32 %v1000_v33, %v227_v32 }
 0x16f   : > { %1004 = vst.msk [vmem:[#allocation2] sm:$0x1] %vm209_vm0, %v1002_v28 }
 0x176   : > { %v1008_v42 = vld [vmem:[#allocation2] sm:$0x1] }
 0x177   : > { %1224 = vmatmul.mubr.msk.f32.vlgmr.msra.gmra.mxu0 %vm1018_vm9, %v1008_v42 }
 0x237   : > { %v1088_v34 = vpop.f32.mrf.mxu0 }
 0x238   : > { %v1089_v35 = vadd.f32 %v1088_v34, %v1017_v43 }
 0x239   : > { %v1225_v39 = vpop.f32.mrf.mxu0 }
 0x23a   : > { %1093 = vst.msk [vmem:[%s203_s7] sm:$0x1] %vm1092_vm10, %v1089_v35 }
 0x23b   : > { %1337 = shalt.err (!%p1334_p6)
}
 0x23c   : > { %s1338_s23 = scalar_lea.hbm %s1713_s11, 16  ;;  %s1342_s30 = scalar_lea.hbm %s1758_s3, 32 }
 0x23d   : > { %p1339_p7 = scmp.ne.s32.totalorder %s1713_s11, %s1338_s23  ;;  %p1343_p13 = scmp.lt.s32.totalorder %s1713_s11, %s1758_s3 }
 0x23e   : > { %p1344_p2 = scmp.lt.s32.totalorder %s1342_s30, %s1338_s23 }
 0x23f   : > { %p1340_p10 = pnand %p1339_p7, %p1485_p9 }
 0x240   : > { %p1345_p8 = por %p1344_p2, %p1343_p13 }
 0x241   : > { %p1341_p4 = pneg %p1340_p10 }
 0x243   : > { %p1346_p12 = pnand %p1345_p8, %p1341_p4 }
 0x245   : > { %1349 = shalt.err (!%p1346_p12)
}
 0x246   : > { %1228 = dma.vmem_to_hbm [thread:$0]  (%p1485_p9), %s1108_s8, 16, %s1713_s11, %s1095_s18  }
 0x247 PF: > { %s1119_s5 = sand.u32 1, %s1384_s12   ;;  %p1764_p0 = scmp.ge.s32.totalorder %s1404_s17, 2 }
 0x248   : > { %s1120_s6 = scalar_lea.sflag [#allocation5], %s1119_s5 }
 0x249   : > { %p1235_p1 = pnand %p1764_p0, %p1492_p11 }
 0x24b   : > { %p1236_p3 = pneg %p1235_p1 }
 0x24d   : > { %1379 = dma.done.wait (%p1236_p3), %s1120_s6, 16  }
 0x24e   : > { %1381 = vsyncadd (%p1236_p3), %s1120_s6, 4294967280  ;;  %s19_s17 = sadd.s32 1, %s1404_s17   ;;  %s1765_s12 = smov %s1388_s13 }
 0x24f   : > { %p16_p5 = scmp.ge.s32.totalorder %s19_s17, 4   ;;  %s1766_s13 = smov %s1392_s14 }
 0x250   : > { %s1767_s14 = smov %s1490_s26  ;;  %s1768_s15 = smov %s1400_s16 }
 0x251   : > { %s1769_s16 = smov %s1771_s20  ;;  %18 = sbr.rel (!%p16_p5) target bundleno = 6 (0x6), region = 85 }
 0x256   :  { %1124 = vsyncpa [#allocation4], 1 }
 0x257   :  { %1126 = vsyncpa [#allocation4 + $0x1], 1 }
 0x258   :  { %1127 = vsyncpa [#allocation5], 1 }
 0x259   :  { %1129 = vsyncpa [#allocation5 + $0x1], 1 }

</bundles_post_ra>
